<compile_context>
chip_gen: v7x
topology: tpu7x:2x2x1
jax: 0.10.0
libtpu: 0.0.40
codegen_flags: <defaults>
</compile_context>

<pallas_src>
import jax
import jax.numpy as jnp
from jax.experimental import pallas as pl
from jax.experimental.pallas import tpu as pltpu

_LANE = 128
_SUBLANE = 8


def _round_up(x, m):
    return ((x + m - 1) // m) * m


def _choose_tiling(B, D):
    """Pick (TB, TK, D_pad) so all buffers fit the smallest (v5e) scoped VMEM."""
    # Total scoped-VMEM budget: 14 MiB fits v5e's 16 MiB default (and v6e/v7x
    # 32 MiB) leaving ~2 MiB for Mosaic internal scratch.  Sized per TensorCore,
    # so it is also safe on v7x's 64 MiB / 2-TC parts.
    budget = 14 * 1024 * 1024
    b_pad = _round_up(B, _SUBLANE)

    # Feature-dim tile: single block (TK == D, exempt from the 128 rule) when a
    # lane-padded row is small; otherwise split the reduction into 128-aligned
    # chunks (D is zero-padded in the wrapper so every K tile is exact).
    max_tk = 4096
    if _round_up(D, _LANE) <= max_tk:
        tk = D
        d_pad = D
    else:
        tk = max_tk                     # multiple of 128
        d_pad = _round_up(D, tk)
    lane_tk = _round_up(tk, _LANE)      # physical VMEM row width of one x tile

    # Per-batch-row VMEM cost: double-buffered x row + double-buffered
    # lane-padded (TB,1) output row + (TB,1) f32 scratch row.
    per_row = 2 * lane_tk * 4 + 2 * _LANE * 4 + _LANE * 4
    # Fixed cost: double-buffered, sublane-padded (1, TK) weight tile.
    fixed = 2 * _SUBLANE * lane_tk * 4

    tb_budget = max(_SUBLANE, ((budget - fixed) // per_row) // _SUBLANE * _SUBLANE)
    # Keep >= ~4 batch tiles so pipelining overlaps and v7x can shard the
    # "parallel" axis across both TensorCores.
    tb_depth = _round_up(max(1, -(-b_pad // 4)), _SUBLANE)

    tb = max(_SUBLANE, min(tb_budget, tb_depth, b_pad))
    return tb, tk, d_pad


def _linreg_kernel(x_ref, w_ref, o_ref, acc_ref):
    # x_ref: (TB, TK), w_ref: (1, TK), o_ref: (TB, 1), acc_ref: (TB, 1) f32.
    k = pl.program_id(1)

    @pl.when(k == 0)
    def _():
        acc_ref[...] = jnp.zeros_like(acc_ref)

    # VPU multiply + XLU lane reduce, accumulated in f32.
    acc_ref[...] += jnp.sum(x_ref[...] * w_ref[...], axis=-1, keepdims=True)

    @pl.when(k == pl.num_programs(1) - 1)
    def _():
        o_ref[...] = acc_ref[...].astype(o_ref.dtype)


def linear_regression_forward(x, weight):
    """x: (B, D) float32, weight: (1, D) float32 (PyTorch nn.Linear layout).

    Returns (B, 1) float32, matching nn.Linear(D, 1, bias=False)(x).
    """
    B, D = x.shape
    assert weight.shape == (1, D)
    x = x.astype(jnp.float32)
    weight = weight.astype(jnp.float32)

    TB, TK, d_pad = _choose_tiling(B, D)

    if d_pad != D:
        # Zero-pad the feature dim so every (TB, TK) K-tile holds real zeros
        # (padded columns contribute exactly 0 to the reduction).
        x = jnp.pad(x, ((0, 0), (0, d_pad - D)))
        weight = jnp.pad(weight, ((0, 0), (0, d_pad - D)))

    num_b = pl.cdiv(B, TB)          # ragged last batch tile: rows clipped on writeback
    num_k = d_pad // TK
    grid = (num_b, num_k)           # reduction axis last, marked "arbitrary"

    cost = pl.CostEstimate(
        flops=2 * B * d_pad,
        transcendentals=0,
        bytes_accessed=4 * (B * d_pad + num_b * d_pad + B),
    )

    return pl.pallas_call(
        _linreg_kernel,
        out_shape=jax.ShapeDtypeStruct((B, 1), jnp.float32),
        grid=grid,
        in_specs=[
            pl.BlockSpec((TB, TK), lambda i, k: (i, k)),   # stream x tiles
            pl.BlockSpec((1, TK), lambda i, k: (0, k)),    # weight tile in VMEM
        ],
        out_specs=pl.BlockSpec((TB, 1), lambda i, k: (i, 0)),
        scratch_shapes=[pltpu.VMEM((TB, 1), jnp.float32)],
        compiler_params=pltpu.CompilerParams(
            # Batch tiles independent -> shard across TensorCores; K is a
            # sequential reduction into the resident output block.
            dimension_semantics=("parallel", "arbitrary"),
        ),
        cost_estimate=cost,
    )(x, weight)


if __name__ == "__main__":
    key = jax.random.PRNGKey(0)
    kx, kw = jax.random.split(key)

    # Small demo shapes consistent with the module.
    batch, input_dim = 8, 32
    x = jax.random.normal(kx, (batch, input_dim), dtype=jnp.float32)
    # Deterministic "init" mimicking nn.Linear default uniform(-1/sqrt(D), 1/sqrt(D)).
    bound = 1.0 / jnp.sqrt(jnp.float32(input_dim))
    weight = jax.random.uniform(
        kw, (1, input_dim), dtype=jnp.float32, minval=-bound, maxval=bound
    )

    out = linear_regression_forward(x, weight)
    out = jax.block_until_ready(out)

    ref = x @ weight.T
    assert out.shape == (batch, 1)
    assert jnp.allclose(out, ref, atol=1e-5, rtol=1e-5)

    # Second check: exercises the D-reduction split (TK=4096, padded D) and a
    # ragged last batch tile.
    b2, d2 = 40, 4224
    kx2, kw2 = jax.random.split(jax.random.PRNGKey(1))
    x2 = jax.random.normal(kx2, (b2, d2), dtype=jnp.float32)
    w2 = jax.random.uniform(
        kw2, (1, d2), dtype=jnp.float32, minval=-0.02, maxval=0.02
    )
    out2 = jax.block_until_ready(linear_regression_forward(x2, w2))
    ref2 = x2 @ w2.T
    assert out2.shape == (b2, 1)
    assert jnp.allclose(out2, ref2, atol=1e-3, rtol=1e-3)

    print("KERNEL_OK")
</pallas_src>

<mosaic_0001>
module attributes {stable_mosaic.version = 11 : i64} {
  func.func @_linreg_kernel(%arg0: i32, %arg1: i32, %arg2: memref<8x32xf32, #tpu.memory_space<vmem>>, %arg3: memref<1x32xf32, #tpu.memory_space<vmem>>, %arg4: memref<8x1xf32, #tpu.memory_space<vmem>>, %arg5: memref<8x1xf32, #tpu.memory_space<vmem>>) attributes {dimension_semantics = [#tpu.dimension_semantics<parallel>, #tpu.dimension_semantics<arbitrary>], iteration_bounds = array<i64: 1, 1>, scalar_prefetch = 0 : i64, scratch_operands = 1 : i64, tpu.core_type = #tpu.core_type<tc>, window_params = [{transform_indices = @transform_0, window_bounds = array<i64: 8, 32>}, {transform_indices = @transform_1, window_bounds = array<i64: 1, 32>}, {transform_indices = @transform_2, window_bounds = array<i64: 8, 1>}]} {
    %c0_i32 = arith.constant 0 : i32
    %0 = arith.cmpi eq, %arg1, %c0_i32 : i32
    %1 = arith.extui %0 : i1 to i32
    %c0_i32_0 = arith.constant 0 : i32
    %2 = arith.cmpi ne, %1, %c0_i32_0 : i32
    scf.if %2 {
      %cst_10 = arith.constant 0.000000e+00 : f32
      %15 = vector.broadcast %cst_10 : f32 to vector<8x1xf32>
      %c0_11 = arith.constant 0 : index
      %c0_12 = arith.constant 0 : index
      %16 = vector.load %arg5[%c0_11, %c0_12] : memref<8x1xf32, #tpu.memory_space<vmem>>, vector<8x1xf32>
      tpu.vector_store %arg5[%c0_11, %c0_12], %15 {strides = array<i32>} : memref<8x1xf32, #tpu.memory_space<vmem>>, vector<8x1xf32>,
    } else {
    }
    %c0 = arith.constant 0 : index
    %c0_1 = arith.constant 0 : index
    %3 = vector.load %arg5[%c0, %c0_1] : memref<8x1xf32, #tpu.memory_space<vmem>>, vector<8x1xf32>
    %c0_2 = arith.constant 0 : index
    %c0_3 = arith.constant 0 : index
    %4 = vector.load %arg2[%c0_2, %c0_3] : memref<8x32xf32, #tpu.memory_space<vmem>>, vector<8x32xf32>
    %c0_4 = arith.constant 0 : index
    %c0_5 = arith.constant 0 : index
    %5 = vector.load %arg3[%c0_4, %c0_5] : memref<1x32xf32, #tpu.memory_space<vmem>>, vector<1x32xf32>
    %6 = vector.broadcast %5 : vector<1x32xf32> to vector<8x32xf32>
    %7 = arith.mulf %4, %6 : vector<8x32xf32>
    %cst = arith.constant dense<0.000000e+00> : vector<8xf32>
    %8 = vector.multi_reduction <add>, %7, %cst [1] : vector<8x32xf32> to vector<8xf32>
    %9 = vector.shape_cast %8 : vector<8xf32> to vector<8x1xf32>
    %10 = arith.addf %3, %9 : vector<8x1xf32>
    %c0_6 = arith.constant 0 : index
    %c0_7 = arith.constant 0 : index
    %11 = vector.load %arg5[%c0_6, %c0_7] : memref<8x1xf32, #tpu.memory_space<vmem>>, vector<8x1xf32>
    tpu.vector_store %arg5[%c0_6, %c0_7], %10 {strides = array<i32>} : memref<8x1xf32, #tpu.memory_space<vmem>>, vector<8x1xf32>,
    %c0_i32_8 = arith.constant 0 : i32
    %12 = arith.cmpi eq, %arg1, %c0_i32_8 : i32
    %13 = arith.extui %12 : i1 to i32
    %c0_i32_9 = arith.constant 0 : i32
    %14 = arith.cmpi ne, %13, %c0_i32_9 : i32
    scf.if %14 {
      %c0_10 = arith.constant 0 : index
      %c0_11 = arith.constant 0 : index
      %15 = vector.load %arg5[%c0_10, %c0_11] : memref<8x1xf32, #tpu.memory_space<vmem>>, vector<8x1xf32>
      %c0_12 = arith.constant 0 : index
      %c0_13 = arith.constant 0 : index
      %16 = vector.load %arg4[%c0_12, %c0_13] : memref<8x1xf32, #tpu.memory_space<vmem>>, vector<8x1xf32>
      tpu.vector_store %arg4[%c0_12, %c0_13], %15 {strides = array<i32>} : memref<8x1xf32, #tpu.memory_space<vmem>>, vector<8x1xf32>,
    } else {
    }
    return
  }
  func.func @transform_0(%arg0: i32, %arg1: i32) -> (i32, i32) {
    %c0_i32 = arith.constant 0 : i32
    return %arg0, %arg1 : i32, i32
  }
  func.func @transform_1(%arg0: i32, %arg1: i32) -> (i32, i32) {
    %c0_i32 = arith.constant 0 : i32
    %c0_i32_0 = arith.constant 0 : i32
    return %c0_i32, %arg1 : i32, i32
  }
  func.func @transform_2(%arg0: i32, %arg1: i32) -> (i32, i32) {
    %c0_i32 = arith.constant 0 : i32
    %c0_i32_0 = arith.constant 0 : i32
    return %arg0, %c0_i32 : i32, i32
  }
}

</mosaic_0001>

<bundles_post_ra>
// kernel: tpu_custom_call.1
= control target key start
LH: loop header
LB: loop body
LE: loop exit
PB: predicated region body
PF: predicated region fallthrough
CT: control target
= control target key end

     0   :  { %7 = vsyncpa [#allocation4], 0  ;;  %s83_s9 = smov [#allocation3]   ;;  %s118_s0 = inlined_call_operand.hbm [shape: f32[8,32], index: 0, kind: input, shape index: {}]   ;;  %s119_s1 = inlined_call_operand.vmem [shape: f32[1,32], index: 1, kind: input, shape index: {}]   ;;  %s120_s2 = inlined_call_operand.vmem [shape: f32[8,1], index: 2, kind: output, shape index: {}]  }
   0x1   :  { %s14_s10 = sshll.u32 %s83_s9, 4  ;;  %s59_s13 = scalar_lea.hbm %s118_s0, 128  ;;  %s15_s10 = int_to_ptr.vmem [resolvable:$true] %s14_s10 }
   0x2   :  { %p60_p0 = scmp.ne.s32.totalorder %s118_s0, %s59_s13  ;;  %p63_p1 = scmp.lt.u32.totalorder %s59_s13, %s118_s0 }
   0x4   :  { %p65_p2 = pnand %p63_p1, %p60_p0 }
   0x6   :  { %68 = shalt.err (!%p65_p2)
}
   0x7   :  { %s69_s18 = scalar_lea.vmem %s15_s10, 128  ;;  %p74_p4 = scmp.lt.s32.totalorder %s15_s10, %s15_s10 }
   0x8   :  { %p70_p3 = scmp.ne.s32.totalorder %s15_s10, %s69_s18  ;;  %p75_p5 = scmp.lt.s32.totalorder %s69_s18, %s69_s18 }
   0xa   :  { %p76_p6 = por %p75_p5, %p74_p4 }
   0xc   :  { %p77_p7 = pnand %p76_p6, %p70_p3 }
   0xe   :  { %80 = shalt.err (!%p77_p7)
}
   0xf   :  { %17 = dma.hbm_to_vmem [thread:$0]  %s118_s0, 128, %s15_s10, [#allocation4]  }
  0x10   :  { %81 = dma.done.wait [#allocation4], 128  }
  0x11   :  { %82 = vsyncadd [#allocation4], 4294967168  ;;  %vm27_vm0 = vcmask 7168   ;;  %v84_v0 = vmov 0.0   ;;  %v30_v1 = vld [vmem:[#allocation3] sm:$0xff]  ;;  %vm39_vm1 = vcmask 261120  }
  0x12   :  { %28 = vst.msk [vmem:[#allocation2] sm:$0xff] %vm27_vm0, %v84_v0  ;;  %v56_v2 = vld [vmem:[%s119_s1] ss:$0 sm:$0xff] }
  0x13   :  { %v38_v3 = vmul.f32 %v56_v2, %v30_v1 }
  0x15   :  { %v40_v4 = vsel %vm39_vm1, %v38_v3, 0.0 }
  0x16   :  { %41 = vadd.xlane.f32.xlu0 %v40_v4 }
  0x19   :  { %v29_v5 = vld [vmem:[#allocation2] sm:$0xff] }
  0xa3   :  { %v42_v6 = vpop.xlane.xlu0 %41 }
  0xa4   :  { %v43_v7 = vadd.f32 %v42_v6, %v29_v5 }
  0xa6   :  { %45 = vst.msk [vmem:[#allocation2] sm:$0xff] %vm27_vm0, %v43_v7 }
  0xad   :  { %v49_v8 = vld [vmem:[#allocation2] sm:$0xff] }
  0xae   :  { %50 = vst.msk [vmem:[%s120_s2] sm:$0xff] %vm27_vm0, %v49_v8 }
  0xaf   :  { %55 = vsyncpa [#allocation4], 1 }

</bundles_post_ra>
